<compile_context>
chip_gen: v7x
topology: tpu7x:2x2x1
jax: 0.10.0
libtpu: 0.0.40
codegen_flags: <defaults>
</compile_context>

<pallas_src>
import jax
import jax.numpy as jnp
from jax import lax
from jax.experimental import pallas as pl
from jax.experimental.pallas import tpu as pltpu


# ---------------------------------------------------------------------------
# Shared in-kernel math.
# ---------------------------------------------------------------------------

def _lap_sq(x):
    """Fixed-Laplacian 3x3 VALID depthwise conv, squared. x: (P, H, W) f32."""
    _, h, w = x.shape
    oh, ow = h - 2, w - 2
    # Horizontal 3-tap: only 3 lane-shifted slices total.
    c0 = x[:, :, 0:ow]
    c1 = x[:, :, 1:ow + 1]
    c2 = x[:, :, 2:ow + 2]
    rs = c0 + c1 + c2                                          # (P, H, ow)
    # Vertical 3-tap via cheap sublane-offset slices.
    box = rs[:, 0:oh, :] + rs[:, 1:oh + 1, :] + rs[:, 2:oh + 2, :]
    center = c1[:, 1:oh + 1, :]                                # x[:, 1:H-1, 1:W-1]
    # Kernel [[1/8,1/8,1/8],[1/8,-1,1/8],[1/8,1/8,1/8]]: (1/8)*box - (9/8)*center.
    y = 0.125 * box - 1.125 * center
    return y * y


def _signed_max_kernel(a, b):
    """torch.round((a+b) // (|a+b|+1e-10)) * max(|a|,|b|).

    The float floor-division already yields exact integers in {-1, 0}, so the
    trailing torch.round is an identity and is omitted inside the kernel.
    """
    s = a + b
    sgn = jnp.floor(s / (jnp.abs(s) + 1e-10))
    return sgn * jnp.maximum(jnp.abs(a), jnp.abs(b))


# ---------------------------------------------------------------------------
# Pallas kernels.
# ---------------------------------------------------------------------------

def _laplacian_sq_kernel(x_ref, o_ref):
    # x_ref: (P, H, W); o_ref: (P, H-2, W-2).
    o_ref[...] = _lap_sq(x_ref[...].astype(jnp.float32)).astype(o_ref.dtype)


def _fused_content_kernel(ir_ref, vi_ref, fu_ref, o_ref):
    # ir/vi/fu: (P, H, W) blocks; o_ref: (1, 8, 128) partial-sum tile.
    ir = ir_ref[...].astype(jnp.float32)
    vi = vi_ref[...].astype(jnp.float32)
    fu = fu_ref[...].astype(jnp.float32)

    # Intensity L1 term: |fusion - signed_max(vi, ir)| summed over the block.
    int_sum = jnp.sum(jnp.abs(fu - _signed_max_kernel(vi, ir)))

    # Gradient L1 term: |grad(fusion) - signed_max(grad(vi), grad(ir))| summed.
    g_vi = _lap_sq(vi)
    g_ir = _lap_sq(ir)
    g_fu = _lap_sq(fu)
    grad_sum = jnp.sum(jnp.abs(g_fu - _signed_max_kernel(g_vi, g_ir)))

    # Pack the two scalars into one aligned (8,128) tile: sublane 0 -> intensity
    # partial sum, sublane 1 -> gradient partial sum, rest zero.
    row = lax.broadcasted_iota(jnp.int32, (8, 128), 0)
    tile = jnp.where(row == 0, int_sum, jnp.where(row == 1, grad_sum, 0.0))
    o_ref[...] = tile[None].astype(o_ref.dtype)


# ---------------------------------------------------------------------------
# Tiling helpers.
# ---------------------------------------------------------------------------

def _vmem_capacity_bytes():
    try:
        info = pltpu.get_tpu_info()
        cap = getattr(info, "vmem_capacity_bytes", None)
        if cap:
            return int(cap)
    except Exception:
        pass
    return 64 << 20          # conservative default (v7x per-TensorCore VMEM)


def _largest_divisor_le(n, cap):
    cap = max(1, min(cap, n))
    for d in range(cap, 0, -1):
        if n % d == 0:
            return d
    return 1


# ---------------------------------------------------------------------------
# gradient.forward(x): standalone Pallas op (kept for the module API).
# ---------------------------------------------------------------------------

def gradient_forward(x):
    """Fixed-Laplacian depthwise 3x3 valid conv, squared. (N,C,H,W)->(N,C,H-2,W-2)."""
    n, c, h, w = x.shape
    assert h >= 3 and w >= 3, "gradient requires spatial dims >= 3"
    oh, ow = h - 2, w - 2

    # Lane-dense output: pad W so the stored width (W_pad - 2) is a multiple of
    # 128 (unmasked vst) when the overhead is small; tiny widths skip it.
    pad_w = (-(w - 2)) % 128
    if not (pad_w > 0 and w >= 128 and 4 * pad_w <= w):
        pad_w = 0
    wp = w + pad_w
    owp = wp - 2

    nc = n * c
    xr = x.reshape(nc, h, w)
    if pad_w:
        xr = jnp.pad(xr, ((0, 0), (0, 0), (0, pad_w)))

    itemsize = jnp.dtype(x.dtype).itemsize
    cap = _vmem_capacity_bytes()
    block_budget = min(cap // 6, 24 << 20)
    vmem_limit = int(min(cap * 3 // 4, 96 << 20))

    per_plane = 2 * (h * wp + oh * owp) * itemsize     # in + out, double-buffered
    max_p = max(1, block_budget // per_plane)
    if nc >= 2:
        max_p = min(max_p, nc // 2)    # keep >= 2 "parallel" steps (v7x megacore)
    p = _largest_divisor_le(nc, max_p)
    # TODO(synk): planes too large even for P=1 should be row-tiled with a 2-row halo.

    out = pl.pallas_call(
        _laplacian_sq_kernel,
        out_shape=jax.ShapeDtypeStruct((nc, oh, owp), x.dtype),
        grid=(nc // p,),
        in_specs=[pl.BlockSpec((p, h, wp), lambda i: (i, 0, 0))],
        out_specs=pl.BlockSpec((p, oh, owp), lambda i: (i, 0, 0)),
        compiler_params=pltpu.CompilerParams(
            dimension_semantics=("parallel",),
            vmem_limit_bytes=vmem_limit),
    )(xr)

    if pad_w:
        out = out[:, :, :ow]
    return out.reshape(n, c, oh, ow)


# ---------------------------------------------------------------------------
# Fused intensity + gradient loss partial sums (the hot path of the forward).
# ---------------------------------------------------------------------------

def _content_partial_sums(img_ir, img_vi, img_fusion):
    n, c, h, w = img_ir.shape
    assert img_vi.shape == img_ir.shape == img_fusion.shape
    assert h >= 3 and w >= 3
    nc = n * c
    ir = img_ir.reshape(nc, h, w)
    vi = img_vi.reshape(nc, h, w)
    fu = img_fusion.reshape(nc, h, w)

    itemsize = jnp.dtype(img_ir.dtype).itemsize
    cap = _vmem_capacity_bytes()
    block_budget = min(cap // 4, 32 << 20)
    vmem_limit = int(min(cap * 3 // 4, 96 << 20))

    # 3 double-buffered input planes + rough allowance for f32 temporaries.
    per_plane = (6 * itemsize + 48) * h * w
    max_p = max(1, block_budget // per_plane)
    if nc >= 2:
        max_p = min(max_p, nc // 2)    # keep >= 2 "parallel" steps (v7x megacore)
    p = _largest_divisor_le(nc, max_p)
    g = nc // p
    # TODO(synk): planes too large even for P=1 should be row-tiled with a 2-row halo.

    in_spec = pl.BlockSpec((p, h, w), lambda i: (i, 0, 0))
    partials = pl.pallas_call(
        _fused_content_kernel,
        out_shape=jax.ShapeDtypeStruct((g, 8, 128), jnp.float32),
        grid=(g,),
        in_specs=[in_spec, in_spec, in_spec],
        out_specs=pl.BlockSpec((1, 8, 128), lambda i: (i, 0, 0)),
        compiler_params=pltpu.CompilerParams(
            dimension_semantics=("parallel",),
            vmem_limit_bytes=vmem_limit),
    )(ir, vi, fu)

    int_total = jnp.sum(partials[:, 0, 0])
    grad_total = jnp.sum(partials[:, 1, 0])
    return int_total, grad_total


# ---------------------------------------------------------------------------
# SSIM (pure JAX / XLA) + full forward.
# ---------------------------------------------------------------------------

_C1 = (0.01 * 255) ** 2
_C2 = (0.03 * 255) ** 2


def _gaussian_window(size, sigma):
    coords = jnp.arange(size, dtype=jnp.float32) - (size // 2)
    g = jnp.exp(-(coords ** 2) / (2.0 * sigma ** 2))
    return (g / g.sum()).reshape(1, 1, 1, size)


def _ssim(img1, img2, window_size=11):
    # Faithful to the reference: a 1x11 Gaussian window applied with padding=5 on
    # BOTH spatial dims (so the filtered maps are taller than the inputs).
    c = img1.shape[1]
    w = jnp.tile(_gaussian_window(window_size, 1.5), (c, 1, 1, 1))
    pad = window_size // 2

    def conv(t):
        return lax.conv_general_dilated(
            t, w, (1, 1), ((pad, pad), (pad, pad)),
            dimension_numbers=("NCHW", "OIHW", "NCHW"),
            feature_group_count=c, precision=lax.Precision.HIGHEST)

    mu1, mu2 = conv(img1), conv(img2)
    mu1_sq, mu2_sq, mu1_mu2 = mu1 * mu1, mu2 * mu2, mu1 * mu2
    sigma1_sq = conv(img1 * img1) - mu1_sq
    sigma2_sq = conv(img2 * img2) - mu2_sq
    sigma12 = conv(img1 * img2) - mu1_mu2
    ssim_map = ((2.0 * mu1_mu2 + _C1) * (2.0 * sigma12 + _C2)) / (
        (mu1_sq + mu2_sq + _C1) * (sigma1_sq + sigma2_sq + _C2))
    return jnp.mean(ssim_map)


def g_content_loss_forward(img_ir, img_vi, img_fusion):
    """Forward of g_content_loss: (content_loss, intensity_loss, grad_loss)."""
    n, c, h, w = img_ir.shape
    int_total, grad_total = _content_partial_sums(img_ir, img_vi, img_fusion)
    intensity_loss = 1.0 * int_total / (n * c * h * w)
    grad_loss = 15.0 * grad_total / (n * c * (h - 2) * (w - 2))
    # TODO(synk): SSIM (Gaussian convs) and the final scalar arithmetic are left
    # to XLA; the Pallas kernel covers the Laplacian^2 stencil + fusion + L1 sums.
    ssim_loss = 5.0 * ((1.0 - _ssim(img_fusion, img_vi))
                       + (1.0 - _ssim(img_fusion, img_ir)))
    content_loss = intensity_loss + grad_loss + ssim_loss
    return content_loss, intensity_loss, grad_loss


# ---------------------------------------------------------------------------
# Pure-JAX reference for validation.
# ---------------------------------------------------------------------------

def _gradient_reference(x):
    c = x.shape[1]
    k = jnp.array([[1 / 8, 1 / 8, 1 / 8],
                   [1 / 8, -1.0, 1 / 8],
                   [1 / 8, 1 / 8, 1 / 8]], jnp.float32)
    w = jnp.tile(k[None, None], (c, 1, 1, 1))          # (C, 1, 3, 3) OIHW
    y = lax.conv_general_dilated(
        x, w, (1, 1), "VALID",
        dimension_numbers=("NCHW", "OIHW", "NCHW"),
        feature_group_count=c, precision=lax.Precision.HIGHEST)
    return y * y


def _signed_max_reference(a, b):
    s = a + b
    return (jnp.round(jnp.floor_divide(s, jnp.abs(s) + 1e-10))
            * jnp.maximum(jnp.abs(a), jnp.abs(b)))


def _g_content_loss_reference(img_ir, img_vi, img_fusion):
    gvi = _gradient_reference(img_vi)
    gir = _gradient_reference(img_ir)
    gfu = _gradient_reference(img_fusion)
    max_grad = _signed_max_reference(gvi, gir)
    max_int = _signed_max_reference(img_vi, img_ir)
    intensity_loss = 1.0 * jnp.mean(jnp.abs(img_fusion - max_int))
    grad_loss = 15.0 * jnp.mean(jnp.abs(gfu - max_grad))
    ssim_loss = 5.0 * ((1.0 - _ssim(img_fusion, img_vi))
                       + (1.0 - _ssim(img_fusion, img_ir)))
    return intensity_loss + grad_loss + ssim_loss, intensity_loss, grad_loss


if __name__ == "__main__":
    key = jax.random.PRNGKey(0)
    k_ir, k_vi, k_fu, k_w = jax.random.split(key, 4)
    n, c, h, w = 2, 1, 16, 16          # g_content_loss uses gradient(channels=1)
    img_ir = jax.random.normal(k_ir, (n, c, h, w), jnp.float32)
    img_vi = jax.random.normal(k_vi, (n, c, h, w), jnp.float32)
    img_fusion = jax.random.normal(k_fu, (n, c, h, w), jnp.float32)

    # 1) Standalone Pallas gradient kernel vs. depthwise-conv reference.
    g = jax.block_until_ready(gradient_forward(img_vi))
    assert g.shape == (n, c, h - 2, w - 2)
    assert jnp.allclose(g, _gradient_reference(img_vi), atol=1e-5, rtol=1e-5)

    # 2) Lane-dense (padded-width) gradient path.
    x_wide = jax.random.normal(k_w, (2, 1, 16, 256), jnp.float32)
    g_wide = jax.block_until_ready(gradient_forward(x_wide))
    assert jnp.allclose(g_wide, _gradient_reference(x_wide), atol=1e-5, rtol=1e-5)

    # 3) Full fused forward (single Pallas kernel for intensity + grad losses)
    #    vs. all-JAX reference.
    losses = jax.block_until_ready(g_content_loss_forward(img_ir, img_vi, img_fusion))
    losses_ref = _g_content_loss_reference(img_ir, img_vi, img_fusion)
    for got, ref in zip(losses, losses_ref):
        assert jnp.isfinite(got)
        assert jnp.allclose(got, ref, atol=1e-4, rtol=1e-4)

    print("KERNEL_OK")
</pallas_src>

<mosaic_0001>
module attributes {stable_mosaic.version = 11 : i64} {
  func.func @_laplacian_sq_kernel(%arg0: i32, %arg1: memref<1x16x16xf32, #tpu.memory_space<vmem>>, %arg2: memref<1x14x14xf32, #tpu.memory_space<vmem>>) attributes {dimension_semantics = [#tpu.dimension_semantics<parallel>], iteration_bounds = array<i64: 2>, scalar_prefetch = 0 : i64, scratch_operands = 0 : i64, tpu.core_type = #tpu.core_type<tc>, window_params = [{transform_indices = @transform_0, window_bounds = array<i64: 1, 16, 16>}, {transform_indices = @transform_1, window_bounds = array<i64: 1, 14, 14>}]} {
    %c0 = arith.constant 0 : index
    %c0_0 = arith.constant 0 : index
    %c0_1 = arith.constant 0 : index
    %0 = vector.load %arg1[%c0, %c0_0, %c0_1] : memref<1x16x16xf32, #tpu.memory_space<vmem>>, vector<1x16x16xf32>
    %1 = vector.extract_strided_slice %0 {offsets = [0, 0, 0], sizes = [1, 16, 14], strides = [1, 1, 1]} : vector<1x16x16xf32> to vector<1x16x14xf32>
    %2 = vector.extract_strided_slice %0 {offsets = [0, 0, 1], sizes = [1, 16, 14], strides = [1, 1, 1]} : vector<1x16x16xf32> to vector<1x16x14xf32>
    %3 = vector.extract_strided_slice %0 {offsets = [0, 0, 2], sizes = [1, 16, 14], strides = [1, 1, 1]} : vector<1x16x16xf32> to vector<1x16x14xf32>
    %4 = arith.addf %1, %2 : vector<1x16x14xf32>
    %5 = arith.addf %4, %3 : vector<1x16x14xf32>
    %6 = vector.extract_strided_slice %5 {offsets = [0, 0, 0], sizes = [1, 14, 14], strides = [1, 1, 1]} : vector<1x16x14xf32> to vector<1x14x14xf32>
    %7 = vector.extract_strided_slice %5 {offsets = [0, 1, 0], sizes = [1, 14, 14], strides = [1, 1, 1]} : vector<1x16x14xf32> to vector<1x14x14xf32>
    %8 = arith.addf %6, %7 : vector<1x14x14xf32>
    %9 = vector.extract_strided_slice %5 {offsets = [0, 2, 0], sizes = [1, 14, 14], strides = [1, 1, 1]} : vector<1x16x14xf32> to vector<1x14x14xf32>
    %10 = arith.addf %8, %9 : vector<1x14x14xf32>
    %11 = vector.extract_strided_slice %2 {offsets = [0, 1, 0], sizes = [1, 14, 14], strides = [1, 1, 1]} : vector<1x16x14xf32> to vector<1x14x14xf32>
    %cst = arith.constant 1.250000e-01 : f32
    %12 = vector.broadcast %cst : f32 to vector<1x14x14xf32>
    %13 = arith.mulf %12, %10 : vector<1x14x14xf32>
    %cst_2 = arith.constant 1.125000e+00 : f32
    %14 = vector.broadcast %cst_2 : f32 to vector<1x14x14xf32>
    %15 = arith.mulf %14, %11 : vector<1x14x14xf32>
    %16 = arith.subf %13, %15 : vector<1x14x14xf32>
    %17 = arith.mulf %16, %16 : vector<1x14x14xf32>
    %c0_3 = arith.constant 0 : index
    %c0_4 = arith.constant 0 : index
    %c0_5 = arith.constant 0 : index
    %18 = vector.load %arg2[%c0_3, %c0_4, %c0_5] : memref<1x14x14xf32, #tpu.memory_space<vmem>>, vector<1x14x14xf32>
    tpu.vector_store %arg2[%c0_3, %c0_4, %c0_5], %17 {strides = array<i32>} : memref<1x14x14xf32, #tpu.memory_space<vmem>>, vector<1x14x14xf32>,
    return
  }
  func.func @transform_0(%arg0: i32) -> (i32, i32, i32) {
    %c0_i32 = arith.constant 0 : i32
    %c0_i32_0 = arith.constant 0 : i32
    %c0_i32_1 = arith.constant 0 : i32
    return %arg0, %c0_i32, %c0_i32_0 : i32, i32, i32
  }
  func.func @transform_1(%arg0: i32) -> (i32, i32, i32) {
    %c0_i32 = arith.constant 0 : i32
    %c0_i32_0 = arith.constant 0 : i32
    %c0_i32_1 = arith.constant 0 : i32
    return %arg0, %c0_i32, %c0_i32_0 : i32, i32, i32
  }
}

</mosaic_0001>

<bundles_post_ra>
// kernel: tpu_custom_call.1
= control target key start
LH: loop header
LB: loop body
LE: loop exit
PB: predicated region body
PF: predicated region fallthrough
CT: control target
= control target key end

     0   :  { %6 = vsyncpa [#allocation3], 0  ;;  %s513_s0 = inlined_call_operand.hbm [shape: f32[2,16,16], index: 0, kind: input, shape index: {}]   ;;  %s514_s1 = inlined_call_operand.vmem [shape: f32[2,14,14], index: 1, kind: output, shape index: {}]  }
   0x1   :  { %8 = vsyncpa [#allocation3 + $0x1], 0  ;;  %s403_s6 = smov 0   ;;  %s405_s7 = smov 0  }
   0x2   :  { %s407_s8 = smov 0   ;;  %s409_s9 = smov 0  }
   0x3 LB: > { %s422_s10 = sadd.s32 4294967295, %s386_s9   ;;  %s425_s11 = sadd.s32 1, %s386_s9   ;;  %s386_s9 = sphi %s409_s9, %s521_s9   ;;  %s382_s8 = sphi %s407_s8, %s520_s8   ;;  %s378_s7 = sphi %s405_s7, %s519_s7   ;;  %s374_s6 = sphi %s403_s6, %s518_s6  }
   0x4   : > { %s18_s12 = ssub.s32 %s386_s9, %s425_s11  ;;  %s21_s13 = sadd.s32 1, %s382_s8 }
   0x5   : > { %p19_p0 = scmp.eq.s32.totalorder %s18_s12, 0  ;;  %p28_p1 = scmp.ne.s32.totalorder %s382_s8, %s378_s7 }
   0x6   : > { %p29_p2 = scmp.eq.s32.totalorder %s386_s9, 0  ;;  %p34_p3 = scmp.ne.s32.totalorder %s378_s7, %s374_s6 }
   0x7   : > { %s435_s14 = scalar_select %p19_p0, %s382_s8, %s21_s13  }
   0x8   : > { %p30_p4 = por %p29_p2, %p28_p1  ;;  %p35_p5 = scmp.eq.s32.totalorder %s422_s10, 0 }
   0x9   : > { %p285_p6 = scmp.lt.s32.totalorder %s386_s9, 2  ;;  %s84_s16 = sand.u32 1, %s382_s8  }
   0xa   : > { %p439_p7 = por %p35_p5, %p34_p3  ;;  %s268_s17 = sshll.u32 %s84_s16, 4 }
   0xb   : > { %s277_s18 = sshll.u32 %s386_s9, 8  ;;  %s88_s22 = scalar_lea.vmem [#allocation2], %s268_s17 }
   0xc   : > { %s448_s21 = scalar_lea.hbm %s513_s0, %s277_s18  ;;  %s95_s23 = sshll.u32 %s88_s22, 4  ;;  %s450_s23 = int_to_ptr.vmem [resolvable:$true] %s95_s23 }
   0xd   : > { %p452_p8 = pnand %p285_p6, %p30_p4  ;;  %s457_s25 = scalar_lea.sflag [#allocation3], %s84_s16 }
   0xe   : > { %s322_s26 = scalar_lea.hbm %s448_s21, 256  ;;  %s327_s29 = scalar_lea.hbm %s513_s0, 512 }
   0xf   : > { %p323_p10 = scmp.ne.s32.totalorder %s448_s21, %s322_s26  ;;  %p324_p11 = pneg %p452_p8 }
  0x10   : > { %p328_p0 = scmp.lt.u32.totalorder %s448_s21, %s513_s0  ;;  %p329_p1 = scmp.lt.u32.totalorder %s327_s29, %s322_s26 }
  0x11   : > { %p325_p12 = pnand %p324_p11, %p323_p10  ;;  %p331_p3 = scmp.lt.u32.totalorder %s322_s26, %s448_s21 }
  0x12   : > { %p330_p2 = por %p329_p1, %p328_p0 }
  0x13   : > { %p326_p13 = pneg %p325_p12 }
  0x14   : > { %p332_p4 = por %p331_p3, %p330_p2 }
  0x16   : > { %p333_p5 = pnand %p332_p4, %p326_p13 }
  0x18   : > { %336 = shalt.err (!%p333_p5)
}
  0x19   : > { %s337_s3 = scalar_lea.vmem %s450_s23, 256  ;;  %s388_s4 = smov [#allocation2]  }
  0x1a   : > { %p338_p6 = scmp.ne.s32.totalorder %s450_s23, %s337_s3  ;;  %s342_s5 = sshll.u32 %s388_s4, 4  ;;  %s343_s5 = int_to_ptr.vmem [resolvable:$false] %s342_s5 }
  0x1b   : > { %s344_s6 = scalar_lea.vmem %s343_s5, 512  ;;  %p345_p9 = scmp.lt.s32.totalorder %s450_s23, %s343_s5 }
  0x1c   : > { %p340_p10 = pnand %p338_p6, %p324_p11  ;;  %p346_p0 = scmp.lt.s32.totalorder %s344_s6, %s337_s3 }
  0x1e   : > { %p341_p12 = pneg %p340_p10  ;;  %p347_p1 = por %p346_p0, %p345_p9 }
  0x20   : > { %p348_p2 = pnand %p347_p1, %p341_p12 }
  0x22   : > { %351 = shalt.err (!%p348_p2)
}
  0x23   : > { %s389_s12 = smov 128   ;;  %s390_s13 = smov 8  }
  0x24   : > { %284 = dma.hbm_to_vmem [thread:$0]  (!%p452_p8), %s448_s21, 256, %s450_s23, %s457_s25, %s389_s12, %s389_s12, %s390_s13  }
  0x25   : > { %p103_p11 = scmp.lt.s32.totalorder %s386_s9, 3  ;;  %p517_p13 = scmp.ge.s32.totalorder %s386_s9, 1 }
  0x27   : > { %p104_p3 = pnand %p517_p13, %p103_p11 }
  0x28   : > { %s109_s16 = sand.u32 (!%p104_p3), 1, %s378_s7  }
  0x29   : > { %107 = sbr.rel (%p104_p3) target bundleno = 187 (0xbb), region = 24  ;;  %s272_s17 = sshll.u32 (!%p104_p3), %s109_s16, 4 }
  0x2a   : > { %s110_s18 = scalar_lea.sflag (!%p104_p3), [#allocation3], %s109_s16  ;;  %s113_s19 = scalar_lea.vmem (!%p104_p3), [#allocation2], %s272_s17 }
  0x30   : > { %369 = dma.done.wait (%p439_p7), %s110_s18, 256  }
  0x31   : > { %371 = vsyncadd (%p439_p7), %s110_s18, 4294967040  ;;  %v137_v0 = vld [vmem:[%s113_s19] sm:$0xff]  ;;  %v138_v1 = vld [vmem:[%s113_s19 + $0x8] sm:$0xff]  ;;  %s391_s20 = smov 127   ;;  %s392_s21 = smov 126   ;;  %vm159_vm0 = vcmask 1046528  }
  0x32   : > { %141 = vrot.lane.b32.xlu0 %v137_v0, %s391_s20  ;;  %149 = vrot.lane.b32.xlu1 %v137_v0, %s392_s21  ;;  %v178_v2 = vmul.f32 1.125, %v138_v1  ;;  %v177_v3 = vmul.f32 1.125, %v137_v0  ;;  %p132_p7 = scmp.lt.s32.totalorder %s422_s10, 1  ;;  %vm167_vm1 = vcmask 1045504   ;;  %vm196_vm2 = vcmask 111616  }
  0x33   : > { %vm194_vm3 = vcmask 113664  }
  0x34   : > { %v182_v4 = vrot.slane %v178_v2, 1  ;;  %v181_v5 = vrot.slane %v177_v3, 1  ;;  %s523_s10 = smov (!%p132_p7, %s422_s10), 1 }
  0x35   : > { %s278_s9 = sshll.u32 %s523_s10, 4 }
  0x36   : > { %143 = vrot.lane.b32.xlu0 %v138_v1, %s391_s20  ;;  %151 = vrot.lane.b32.xlu1 %v138_v1, %s392_s21  ;;  %v183_v6 = vsel %vm159_vm0, %v181_v5, %v182_v4  ;;  %s136_s23 = scalar_lea.vmem %s514_s1, %s278_s9 }
  0x3a   : > { %186 = vrot.lane.b32.xlu1 %v182_v4, %s391_s20  ;;  %184 = vrot.lane.b32.xlu0 %v183_v6, %s391_s20 }
  0xa4   : > { %v142_v7 = vpop.permute.xlu0 %141  ;;  %v150_v8 = vpop.permute.xlu1 %149 }
  0xa5   : > { %v147_v9 = vadd.f32 %v142_v7, %v137_v0 }
  0xa7   : > { %v155_v12 = vadd.f32 %v150_v8, %v147_v9 }
  0xa8   : > { %v144_v10 = vpop.permute.xlu0 %143  ;;  %v152_v11 = vpop.permute.xlu1 %151 }
  0xa9   : > { %v148_v13 = vadd.f32 %v144_v10, %v138_v1  ;;  %v160_v15 = vrot.slane %v155_v12, 1  ;;  %v168_v18 = vrot.slane %v155_v12, 2 }
  0xab   : > { %v156_v14 = vadd.f32 %v152_v11, %v148_v13 }
  0xac   : > { %v187_v24 = vpop.permute.xlu1 %186  ;;  %v185_v27 = vpop.permute.xlu0 %184 }
  0xad   : > { %v161_v16 = vrot.slane %v156_v14, 1  ;;  %v169_v17 = vrot.slane %v156_v14, 2 }
  0xaf   : > { %v166_v19 = vadd.f32 %v161_v16, %v156_v14  ;;  %v162_v20 = vsel %vm159_vm0, %v160_v15, %v161_v16  ;;  %v170_v23 = vsel %vm167_vm1, %v168_v18, %v169_v17 }
  0xb0   : > { %v165_v21 = vadd.f32 %v162_v20, %v155_v12 }
  0xb1   : > { %v174_v22 = vadd.f32 %v169_v17, %v166_v19 }
  0xb2   : > { %v173_v25 = vadd.f32 %v170_v23, %v165_v21 }
  0xb3   : > { %v176_v26 = vmul.f32 0.125, %v174_v22 }
  0xb4   : > { %v175_v28 = vmul.f32 0.125, %v173_v25 }
  0xb5   : > { %v191_v29 = vsub.f32 %v176_v26, %v187_v24 }
  0xb6   : > { %v190_v30 = vsub.f32 %v175_v28, %v185_v27 }
  0xb7   : > { %v193_v31 = vmul.f32 %v191_v29, %v191_v29 }
  0xb8   : > { %v192_v32 = vmul.f32 %v190_v30, %v190_v30 }
  0xb9   : > { %197 = vst.msk [vmem:[%s136_s23 + $0x8] sm:$0x3f] %vm196_vm2, %v193_v31 }
  0xba   : > { %195 = vst.msk [vmem:[%s136_s23] sm:$0xff] %vm194_vm3, %v192_v32 }
  0xbb PF: > { %p11_p8 = scmp.ge.s32.totalorder %s425_s11, 4   ;;  %s518_s6 = smov %s378_s7 }
  0xbc   : > { %s519_s7 = smov %s382_s8  ;;  %s520_s8 = smov %s435_s14 }
  0xbd   : > { %s521_s9 = smov %s425_s11  ;;  %13 = sbr.rel (!%p11_p8) target bundleno = 3 (0x3), region = 64 }
  0xc4   :  { %219 = vsyncpa [#allocation3], 1 }
  0xc5   :  { %221 = vsyncpa [#allocation3 + $0x1], 1 }

</bundles_post_ra>
